<compile_context>
chip_gen: v7x
topology: tpu7x:2x2x1
jax: 0.10.0
libtpu: 0.0.40
codegen_flags: <defaults>
</compile_context>

<pallas_src>
import jax
import jax.numpy as jnp
from jax.experimental import pallas as pl
from jax.experimental.pallas import tpu as pltpu

N_BREAKPOINTS = 30
B_LEFT = 0.0
B_RIGHT = 1.0
INTERVAL = (B_RIGHT - B_LEFT) / N_BREAKPOINTS
INV_INTERVAL = N_BREAKPOINTS / (B_RIGHT - B_LEFT)

SUBLANE = 8
LANE = 128
MAX_BLOCK_ROWS = 4096     # 4096 x 128 f32 = 2 MiB/block; 2x(in)+2x(out) = 8 MiB,
                          # safely under v5e's 16 MiB default scoped-VMEM limit.
MIN_BLOCK_ROWS = 512      # keep blocks big enough to amortize ~0.35us/step.


def _round_up(a, b):
    return ((a + b - 1) // b) * b


def _choose_block_rows(rows):
    """Largest practical block, but for multi-block inputs use an even number
    of grid steps (>= 4) so v7x's two TensorCores both get pipelined work."""
    rows_aligned = _round_up(rows, SUBLANE)
    if rows_aligned <= 2 * MIN_BLOCK_ROWS:
        return rows_aligned                          # tiny input: one block
    steps = max(pl.cdiv(rows_aligned, MAX_BLOCK_ROWS), 4)
    steps = min(steps, max(rows_aligned // MIN_BLOCK_ROWS, 2))
    if steps % 2:
        steps += 1                                   # even split across 2 TCs
    return _round_up(pl.cdiv(rows_aligned, steps), SUBLANE)


def _pwl_kernel(packed_ref, scale_ref, x_ref, o_ref):
    """packed_ref: SMEM (N_BREAKPOINTS,) int32, per-segment table packed as
                   (q_slope << 16) | q_y_left  (both unsigned fixed point,
                   q_slope <= 32767 so the int32 is always non-negative).
    scale_ref:   SMEM (4,) f32 = [y_scale, y_min, s_scale, s_min].
    x_ref/o_ref: (block_rows, 128) VMEM tiles."""
    x = x_ref[...]
    xn = x - B_LEFT if B_LEFT else x

    # Segment index — exactly the reference clip(floor((x-b_left)/interval),
    # 0, n-1); kept in f32 (small integers, exact), reused for seg_xl below so
    # slope/y_left and seg_xl always come from the same segment.
    idx = jnp.floor(xn * INV_INTERVAL)
    idx = jnp.minimum(jnp.maximum(idx, 0.0), float(N_BREAKPOINTS - 1))

    # Threshold sweep with ONE select per segment on the packed table
    # (vs. two selects/segment before).  Init is a direct scalar broadcast.
    packed = jnp.full(x.shape, packed_ref[0], dtype=jnp.int32)
    for k in range(1, N_BREAKPOINTS):
        packed = jnp.where(idx >= float(k), packed_ref[k], packed)

    # Unpack once: slope in the top 15 bits (packed >= 0, so the arithmetic
    # shift needs no mask), y_left in the low 16 bits.
    slope = (packed >> 16).astype(jnp.float32) * scale_ref[2] + scale_ref[3]
    y_left = (packed & 0xFFFF).astype(jnp.float32) * scale_ref[0] + scale_ref[1]

    seg_xl = idx * INTERVAL
    out = (xn - seg_xl) * slope + y_left
    o_ref[...] = jnp.minimum(jnp.maximum(out, 0.0), 1.0)


def _build_tables(y_pos):
    """Per-segment (slope, y_left) quantized to 15/16-bit fixed point over
    their dynamic ranges and packed into one int32 per segment."""
    y = y_pos.astype(jnp.float32)
    y_left = y[:N_BREAKPOINTS]
    slope = (y[1:] - y[:-1]) / jnp.float32(INTERVAL)

    y_min = jnp.min(y_left)
    y_scale = jnp.maximum(jnp.max(y_left) - y_min, 1e-12) / 65535.0
    s_min = jnp.min(slope)
    s_scale = jnp.maximum(jnp.max(slope) - s_min, 1e-12) / 32767.0

    q_y = jnp.clip(jnp.round((y_left - y_min) / y_scale), 0.0, 65535.0)
    q_s = jnp.clip(jnp.round((slope - s_min) / s_scale), 0.0, 32767.0)
    packed = q_s.astype(jnp.int32) * 65536 + q_y.astype(jnp.int32)
    scales = jnp.stack([y_scale, y_min, s_scale, s_min]).astype(jnp.float32)
    return packed, scales


@jax.jit
def pwl_tone_mapping(x, y_pos):
    """Forward pass of PWLToneMapping. Returns a one-element list, like the
    PyTorch module."""
    x = x.astype(jnp.float32)
    orig_shape = x.shape
    n = x.size

    packed, scales = _build_tables(y_pos)

    # Flatten to a lane-dense (rows, 128) slab; only a <128-element tail pad
    # is ever materialized (typical image sizes take the no-copy path).
    xf = x.reshape(-1)
    pad = (-n) % LANE
    if pad:
        xf = jnp.concatenate([xf, jnp.zeros((pad,), jnp.float32)])
    x2 = xf.reshape(-1, LANE)
    rows = x2.shape[0]

    block_rows = _choose_block_rows(rows)
    grid = (pl.cdiv(rows, block_rows),)

    out2 = pl.pallas_call(
        _pwl_kernel,
        out_shape=jax.ShapeDtypeStruct(x2.shape, jnp.float32),
        grid=grid,
        in_specs=[
            pl.BlockSpec(memory_space=pltpu.MemorySpace.SMEM),   # packed table
            pl.BlockSpec(memory_space=pltpu.MemorySpace.SMEM),   # scales
            pl.BlockSpec((block_rows, LANE), lambda i: (i, 0)),  # x tile
        ],
        out_specs=pl.BlockSpec((block_rows, LANE), lambda i: (i, 0)),
        compiler_params=pltpu.CompilerParams(
            dimension_semantics=("parallel",)),
        cost_estimate=pl.CostEstimate(
            flops=80 * x2.size, transcendentals=0, bytes_accessed=8 * x2.size),
    )(packed, scales, x2)

    if pad:
        out = out2.reshape(-1)[:n].reshape(orig_shape)
    else:
        out = out2.reshape(orig_shape)
    return [out]


def _reference(x, y_pos):
    """Pure-JAX reference mirroring the PyTorch forward, for a sanity check."""
    x = x.astype(jnp.float32)
    y = y_pos.astype(jnp.float32)
    idx = jnp.floor((x - B_LEFT) / INTERVAL)
    idx = jnp.clip(idx, 0, N_BREAKPOINTS - 1).astype(jnp.int32)
    seg_xl = B_LEFT + idx.astype(jnp.float32) * INTERVAL
    seg_yl = y[idx]
    seg_yr = y[idx + 1]
    slope = (seg_yr - seg_yl) / INTERVAL
    out = (x - seg_xl) * slope + seg_yl
    return jnp.clip(out, 0.0, 1.0)


if __name__ == "__main__":
    key = jax.random.PRNGKey(0)

    # Parameter init exactly as in the module's __init__: linspace(0, 1, 31).
    y_pos = jnp.linspace(B_LEFT, B_RIGHT, N_BREAKPOINTS + 1, dtype=jnp.float32)

    # Small NCHW input; include values outside [0, 1] to exercise the clips /
    # linear extrapolation of the edge segments.
    x = jax.random.uniform(key, (2, 4, 16, 16), dtype=jnp.float32,
                           minval=-0.25, maxval=1.25)

    out_list = pwl_tone_mapping(x, y_pos)
    out = jax.block_until_ready(out_list[0])

    ref = _reference(x, y_pos)
    assert out.shape == x.shape and out.dtype == jnp.float32
    # 16-bit fixed-point table => observed error ~1e-5; assert a safe bound.
    err = float(jnp.max(jnp.abs(out - ref)))
    assert err < 1e-4, f"max abs error {err}"

    print("KERNEL_OK")
</pallas_src>

<mosaic_0001>
module attributes {stable_mosaic.version = 11 : i64} {
  func.func @_pwl_kernel(%arg0: i32, %arg1: memref<30xi32, #tpu.memory_space<smem>>, %arg2: memref<4xf32, #tpu.memory_space<smem>>, %arg3: memref<16x128xf32, #tpu.memory_space<vmem>>, %arg4: memref<16x128xf32, #tpu.memory_space<vmem>>) attributes {dimension_semantics = [#tpu.dimension_semantics<parallel>], iteration_bounds = array<i64: 1>, scalar_prefetch = 0 : i64, scratch_operands = 0 : i64, tpu.core_type = #tpu.core_type<tc>, window_params = [{transform_indices = @transform_0, window_bounds = array<i64: 30>}, {transform_indices = @transform_1, window_bounds = array<i64: 4>}, {transform_indices = @transform_2, window_bounds = array<i64: 16, 128>}, {transform_indices = @transform_3, window_bounds = array<i64: 16, 128>}]} {
    %c0 = arith.constant 0 : index
    %c0_0 = arith.constant 0 : index
    %0 = vector.load %arg3[%c0, %c0_0] : memref<16x128xf32, #tpu.memory_space<vmem>>, vector<16x128xf32>
    %cst = arith.constant 3.000000e+01 : f32
    %1 = vector.broadcast %cst : f32 to vector<16x128xf32>
    %2 = arith.mulf %0, %1 : vector<16x128xf32>
    %3 = math.floor %2 : vector<16x128xf32>
    %cst_1 = arith.constant 0.000000e+00 : f32
    %4 = vector.broadcast %cst_1 : f32 to vector<16x128xf32>
    %5 = arith.maximumf %3, %4 : vector<16x128xf32>
    %cst_2 = arith.constant 2.900000e+01 : f32
    %6 = vector.broadcast %cst_2 : f32 to vector<16x128xf32>
    %7 = arith.minimumf %5, %6 : vector<16x128xf32>
    %c0_3 = arith.constant 0 : index
    %8 = memref.load %arg1[%c0_3] : memref<30xi32, #tpu.memory_space<smem>>
    %9 = vector.broadcast %8 : i32 to vector<16x128xi32>
    %cst_4 = arith.constant 1.000000e+00 : f32
    %10 = vector.broadcast %cst_4 : f32 to vector<16x128xf32>
    %11 = arith.cmpf oge, %7, %10 : vector<16x128xf32>
    %c1 = arith.constant 1 : index
    %12 = memref.load %arg1[%c1] : memref<30xi32, #tpu.memory_space<smem>>
    %13 = vector.broadcast %12 : i32 to vector<16x128xi32>
    %14 = arith.select %11, %13, %9 : vector<16x128xi1>, vector<16x128xi32>
    %cst_5 = arith.constant 2.000000e+00 : f32
    %15 = vector.broadcast %cst_5 : f32 to vector<16x128xf32>
    %16 = arith.cmpf oge, %7, %15 : vector<16x128xf32>
    %c2 = arith.constant 2 : index
    %17 = memref.load %arg1[%c2] : memref<30xi32, #tpu.memory_space<smem>>
    %18 = vector.broadcast %17 : i32 to vector<16x128xi32>
    %19 = arith.select %16, %18, %14 : vector<16x128xi1>, vector<16x128xi32>
    %cst_6 = arith.constant 3.000000e+00 : f32
    %20 = vector.broadcast %cst_6 : f32 to vector<16x128xf32>
    %21 = arith.cmpf oge, %7, %20 : vector<16x128xf32>
    %c3 = arith.constant 3 : index
    %22 = memref.load %arg1[%c3] : memref<30xi32, #tpu.memory_space<smem>>
    %23 = vector.broadcast %22 : i32 to vector<16x128xi32>
    %24 = arith.select %21, %23, %19 : vector<16x128xi1>, vector<16x128xi32>
    %cst_7 = arith.constant 4.000000e+00 : f32
    %25 = vector.broadcast %cst_7 : f32 to vector<16x128xf32>
    %26 = arith.cmpf oge, %7, %25 : vector<16x128xf32>
    %c4 = arith.constant 4 : index
    %27 = memref.load %arg1[%c4] : memref<30xi32, #tpu.memory_space<smem>>
    %28 = vector.broadcast %27 : i32 to vector<16x128xi32>
    %29 = arith.select %26, %28, %24 : vector<16x128xi1>, vector<16x128xi32>
    %cst_8 = arith.constant 5.000000e+00 : f32
    %30 = vector.broadcast %cst_8 : f32 to vector<16x128xf32>
    %31 = arith.cmpf oge, %7, %30 : vector<16x128xf32>
    %c5 = arith.constant 5 : index
    %32 = memref.load %arg1[%c5] : memref<30xi32, #tpu.memory_space<smem>>
    %33 = vector.broadcast %32 : i32 to vector<16x128xi32>
    %34 = arith.select %31, %33, %29 : vector<16x128xi1>, vector<16x128xi32>
    %cst_9 = arith.constant 6.000000e+00 : f32
    %35 = vector.broadcast %cst_9 : f32 to vector<16x128xf32>
    %36 = arith.cmpf oge, %7, %35 : vector<16x128xf32>
    %c6 = arith.constant 6 : index
    %37 = memref.load %arg1[%c6] : memref<30xi32, #tpu.memory_space<smem>>
    %38 = vector.broadcast %37 : i32 to vector<16x128xi32>
    %39 = arith.select %36, %38, %34 : vector<16x128xi1>, vector<16x128xi32>
    %cst_10 = arith.constant 7.000000e+00 : f32
    %40 = vector.broadcast %cst_10 : f32 to vector<16x128xf32>
    %41 = arith.cmpf oge, %7, %40 : vector<16x128xf32>
    %c7 = arith.constant 7 : index
    %42 = memref.load %arg1[%c7] : memref<30xi32, #tpu.memory_space<smem>>
    %43 = vector.broadcast %42 : i32 to vector<16x128xi32>
    %44 = arith.select %41, %43, %39 : vector<16x128xi1>, vector<16x128xi32>
    %cst_11 = arith.constant 8.000000e+00 : f32
    %45 = vector.broadcast %cst_11 : f32 to vector<16x128xf32>
    %46 = arith.cmpf oge, %7, %45 : vector<16x128xf32>
    %c8 = arith.constant 8 : index
    %47 = memref.load %arg1[%c8] : memref<30xi32, #tpu.memory_space<smem>>
    %48 = vector.broadcast %47 : i32 to vector<16x128xi32>
    %49 = arith.select %46, %48, %44 : vector<16x128xi1>, vector<16x128xi32>
    %cst_12 = arith.constant 9.000000e+00 : f32
    %50 = vector.broadcast %cst_12 : f32 to vector<16x128xf32>
    %51 = arith.cmpf oge, %7, %50 : vector<16x128xf32>
    %c9 = arith.constant 9 : index
    %52 = memref.load %arg1[%c9] : memref<30xi32, #tpu.memory_space<smem>>
    %53 = vector.broadcast %52 : i32 to vector<16x128xi32>
    %54 = arith.select %51, %53, %49 : vector<16x128xi1>, vector<16x128xi32>
    %cst_13 = arith.constant 1.000000e+01 : f32
    %55 = vector.broadcast %cst_13 : f32 to vector<16x128xf32>
    %56 = arith.cmpf oge, %7, %55 : vector<16x128xf32>
    %c10 = arith.constant 10 : index
    %57 = memref.load %arg1[%c10] : memref<30xi32, #tpu.memory_space<smem>>
    %58 = vector.broadcast %57 : i32 to vector<16x128xi32>
    %59 = arith.select %56, %58, %54 : vector<16x128xi1>, vector<16x128xi32>
    %cst_14 = arith.constant 1.100000e+01 : f32
    %60 = vector.broadcast %cst_14 : f32 to vector<16x128xf32>
    %61 = arith.cmpf oge, %7, %60 : vector<16x128xf32>
    %c11 = arith.constant 11 : index
    %62 = memref.load %arg1[%c11] : memref<30xi32, #tpu.memory_space<smem>>
    %63 = vector.broadcast %62 : i32 to vector<16x128xi32>
    %64 = arith.select %61, %63, %59 : vector<16x128xi1>, vector<16x128xi32>
    %cst_15 = arith.constant 1.200000e+01 : f32
    %65 = vector.broadcast %cst_15 : f32 to vector<16x128xf32>
    %66 = arith.cmpf oge, %7, %65 : vector<16x128xf32>
    %c12 = arith.constant 12 : index
    %67 = memref.load %arg1[%c12] : memref<30xi32, #tpu.memory_space<smem>>
    %68 = vector.broadcast %67 : i32 to vector<16x128xi32>
    %69 = arith.select %66, %68, %64 : vector<16x128xi1>, vector<16x128xi32>
    %cst_16 = arith.constant 1.300000e+01 : f32
    %70 = vector.broadcast %cst_16 : f32 to vector<16x128xf32>
    %71 = arith.cmpf oge, %7, %70 : vector<16x128xf32>
    %c13 = arith.constant 13 : index
    %72 = memref.load %arg1[%c13] : memref<30xi32, #tpu.memory_space<smem>>
    %73 = vector.broadcast %72 : i32 to vector<16x128xi32>
    %74 = arith.select %71, %73, %69 : vector<16x128xi1>, vector<16x128xi32>
    %cst_17 = arith.constant 1.400000e+01 : f32
    %75 = vector.broadcast %cst_17 : f32 to vector<16x128xf32>
    %76 = arith.cmpf oge, %7, %75 : vector<16x128xf32>
    %c14 = arith.constant 14 : index
    %77 = memref.load %arg1[%c14] : memref<30xi32, #tpu.memory_space<smem>>
    %78 = vector.broadcast %77 : i32 to vector<16x128xi32>
    %79 = arith.select %76, %78, %74 : vector<16x128xi1>, vector<16x128xi32>
    %cst_18 = arith.constant 1.500000e+01 : f32
    %80 = vector.broadcast %cst_18 : f32 to vector<16x128xf32>
    %81 = arith.cmpf oge, %7, %80 : vector<16x128xf32>
    %c15 = arith.constant 15 : index
    %82 = memref.load %arg1[%c15] : memref<30xi32, #tpu.memory_space<smem>>
    %83 = vector.broadcast %82 : i32 to vector<16x128xi32>
    %84 = arith.select %81, %83, %79 : vector<16x128xi1>, vector<16x128xi32>
    %cst_19 = arith.constant 1.600000e+01 : f32
    %85 = vector.broadcast %cst_19 : f32 to vector<16x128xf32>
    %86 = arith.cmpf oge, %7, %85 : vector<16x128xf32>
    %c16 = arith.constant 16 : index
    %87 = memref.load %arg1[%c16] : memref<30xi32, #tpu.memory_space<smem>>
    %88 = vector.broadcast %87 : i32 to vector<16x128xi32>
    %89 = arith.select %86, %88, %84 : vector<16x128xi1>, vector<16x128xi32>
    %cst_20 = arith.constant 1.700000e+01 : f32
    %90 = vector.broadcast %cst_20 : f32 to vector<16x128xf32>
    %91 = arith.cmpf oge, %7, %90 : vector<16x128xf32>
    %c17 = arith.constant 17 : index
    %92 = memref.load %arg1[%c17] : memref<30xi32, #tpu.memory_space<smem>>
    %93 = vector.broadcast %92 : i32 to vector<16x128xi32>
    %94 = arith.select %91, %93, %89 : vector<16x128xi1>, vector<16x128xi32>
    %cst_21 = arith.constant 1.800000e+01 : f32
    %95 = vector.broadcast %cst_21 : f32 to vector<16x128xf32>
    %96 = arith.cmpf oge, %7, %95 : vector<16x128xf32>
    %c18 = arith.constant 18 : index
    %97 = memref.load %arg1[%c18] : memref<30xi32, #tpu.memory_space<smem>>
    %98 = vector.broadcast %97 : i32 to vector<16x128xi32>
    %99 = arith.select %96, %98, %94 : vector<16x128xi1>, vector<16x128xi32>
    %cst_22 = arith.constant 1.900000e+01 : f32
    %100 = vector.broadcast %cst_22 : f32 to vector<16x128xf32>
    %101 = arith.cmpf oge, %7, %100 : vector<16x128xf32>
    %c19 = arith.constant 19 : index
    %102 = memref.load %arg1[%c19] : memref<30xi32, #tpu.memory_space<smem>>
    %103 = vector.broadcast %102 : i32 to vector<16x128xi32>
    %104 = arith.select %101, %103, %99 : vector<16x128xi1>, vector<16x128xi32>
    %cst_23 = arith.constant 2.000000e+01 : f32
    %105 = vector.broadcast %cst_23 : f32 to vector<16x128xf32>
    %106 = arith.cmpf oge, %7, %105 : vector<16x128xf32>
    %c20 = arith.constant 20 : index
    %107 = memref.load %arg1[%c20] : memref<30xi32, #tpu.memory_space<smem>>
    %108 = vector.broadcast %107 : i32 to vector<16x128xi32>
    %109 = arith.select %106, %108, %104 : vector<16x128xi1>, vector<16x128xi32>
    %cst_24 = arith.constant 2.100000e+01 : f32
    %110 = vector.broadcast %cst_24 : f32 to vector<16x128xf32>
    %111 = arith.cmpf oge, %7, %110 : vector<16x128xf32>
    %c21 = arith.constant 21 : index
    %112 = memref.load %arg1[%c21] : memref<30xi32, #tpu.memory_space<smem>>
    %113 = vector.broadcast %112 : i32 to vector<16x128xi32>
    %114 = arith.select %111, %113, %109 : vector<16x128xi1>, vector<16x128xi32>
    %cst_25 = arith.constant 2.200000e+01 : f32
    %115 = vector.broadcast %cst_25 : f32 to vector<16x128xf32>
    %116 = arith.cmpf oge, %7, %115 : vector<16x128xf32>
    %c22 = arith.constant 22 : index
    %117 = memref.load %arg1[%c22] : memref<30xi32, #tpu.memory_space<smem>>
    %118 = vector.broadcast %117 : i32 to vector<16x128xi32>
    %119 = arith.select %116, %118, %114 : vector<16x128xi1>, vector<16x128xi32>
    %cst_26 = arith.constant 2.300000e+01 : f32
    %120 = vector.broadcast %cst_26 : f32 to vector<16x128xf32>
    %121 = arith.cmpf oge, %7, %120 : vector<16x128xf32>
    %c23 = arith.constant 23 : index
    %122 = memref.load %arg1[%c23] : memref<30xi32, #tpu.memory_space<smem>>
    %123 = vector.broadcast %122 : i32 to vector<16x128xi32>
    %124 = arith.select %121, %123, %119 : vector<16x128xi1>, vector<16x128xi32>
    %cst_27 = arith.constant 2.400000e+01 : f32
    %125 = vector.broadcast %cst_27 : f32 to vector<16x128xf32>
    %126 = arith.cmpf oge, %7, %125 : vector<16x128xf32>
    %c24 = arith.constant 24 : index
    %127 = memref.load %arg1[%c24] : memref<30xi32, #tpu.memory_space<smem>>
    %128 = vector.broadcast %127 : i32 to vector<16x128xi32>
    %129 = arith.select %126, %128, %124 : vector<16x128xi1>, vector<16x128xi32>
    %cst_28 = arith.constant 2.500000e+01 : f32
    %130 = vector.broadcast %cst_28 : f32 to vector<16x128xf32>
    %131 = arith.cmpf oge, %7, %130 : vector<16x128xf32>
    %c25 = arith.constant 25 : index
    %132 = memref.load %arg1[%c25] : memref<30xi32, #tpu.memory_space<smem>>
    %133 = vector.broadcast %132 : i32 to vector<16x128xi32>
    %134 = arith.select %131, %133, %129 : vector<16x128xi1>, vector<16x128xi32>
    %cst_29 = arith.constant 2.600000e+01 : f32
    %135 = vector.broadcast %cst_29 : f32 to vector<16x128xf32>
    %136 = arith.cmpf oge, %7, %135 : vector<16x128xf32>
    %c26 = arith.constant 26 : index
    %137 = memref.load %arg1[%c26] : memref<30xi32, #tpu.memory_space<smem>>
    %138 = vector.broadcast %137 : i32 to vector<16x128xi32>
    %139 = arith.select %136, %138, %134 : vector<16x128xi1>, vector<16x128xi32>
    %cst_30 = arith.constant 2.700000e+01 : f32
    %140 = vector.broadcast %cst_30 : f32 to vector<16x128xf32>
    %141 = arith.cmpf oge, %7, %140 : vector<16x128xf32>
    %c27 = arith.constant 27 : index
    %142 = memref.load %arg1[%c27] : memref<30xi32, #tpu.memory_space<smem>>
    %143 = vector.broadcast %142 : i32 to vector<16x128xi32>
    %144 = arith.select %141, %143, %139 : vector<16x128xi1>, vector<16x128xi32>
    %cst_31 = arith.constant 2.800000e+01 : f32
    %145 = vector.broadcast %cst_31 : f32 to vector<16x128xf32>
    %146 = arith.cmpf oge, %7, %145 : vector<16x128xf32>
    %c28 = arith.constant 28 : index
    %147 = memref.load %arg1[%c28] : memref<30xi32, #tpu.memory_space<smem>>
    %148 = vector.broadcast %147 : i32 to vector<16x128xi32>
    %149 = arith.select %146, %148, %144 : vector<16x128xi1>, vector<16x128xi32>
    %cst_32 = arith.constant 2.900000e+01 : f32
    %150 = vector.broadcast %cst_32 : f32 to vector<16x128xf32>
    %151 = arith.cmpf oge, %7, %150 : vector<16x128xf32>
    %c29 = arith.constant 29 : index
    %152 = memref.load %arg1[%c29] : memref<30xi32, #tpu.memory_space<smem>>
    %153 = vector.broadcast %152 : i32 to vector<16x128xi32>
    %154 = arith.select %151, %153, %149 : vector<16x128xi1>, vector<16x128xi32>
    %c16_i32 = arith.constant 16 : i32
    %155 = vector.broadcast %c16_i32 : i32 to vector<16x128xi32>
    %156 = arith.shrsi %154, %155 : vector<16x128xi32>
    %157 = arith.sitofp %156 : vector<16x128xi32> to vector<16x128xf32>
    %c2_33 = arith.constant 2 : index
    %158 = memref.load %arg2[%c2_33] : memref<4xf32, #tpu.memory_space<smem>>
    %159 = vector.broadcast %158 : f32 to vector<16x128xf32>
    %160 = arith.mulf %157, %159 : vector<16x128xf32>
    %c3_34 = arith.constant 3 : index
    %161 = memref.load %arg2[%c3_34] : memref<4xf32, #tpu.memory_space<smem>>
    %162 = vector.broadcast %161 : f32 to vector<16x128xf32>
    %163 = arith.addf %160, %162 : vector<16x128xf32>
    %c65535_i32 = arith.constant 65535 : i32
    %164 = vector.broadcast %c65535_i32 : i32 to vector<16x128xi32>
    %165 = arith.andi %154, %164 : vector<16x128xi32>
    %166 = arith.sitofp %165 : vector<16x128xi32> to vector<16x128xf32>
    %c0_35 = arith.constant 0 : index
    %167 = memref.load %arg2[%c0_35] : memref<4xf32, #tpu.memory_space<smem>>
    %168 = vector.broadcast %167 : f32 to vector<16x128xf32>
    %169 = arith.mulf %166, %168 : vector<16x128xf32>
    %c1_36 = arith.constant 1 : index
    %170 = memref.load %arg2[%c1_36] : memref<4xf32, #tpu.memory_space<smem>>
    %171 = vector.broadcast %170 : f32 to vector<16x128xf32>
    %172 = arith.addf %169, %171 : vector<16x128xf32>
    %cst_37 = arith.constant 0.0333333351 : f32
    %173 = vector.broadcast %cst_37 : f32 to vector<16x128xf32>
    %174 = arith.mulf %7, %173 : vector<16x128xf32>
    %175 = arith.subf %0, %174 : vector<16x128xf32>
    %176 = arith.mulf %175, %163 : vector<16x128xf32>
    %177 = arith.addf %176, %172 : vector<16x128xf32>
    %cst_38 = arith.constant 0.000000e+00 : f32
    %178 = vector.broadcast %cst_38 : f32 to vector<16x128xf32>
    %179 = arith.maximumf %177, %178 : vector<16x128xf32>
    %cst_39 = arith.constant 1.000000e+00 : f32
    %180 = vector.broadcast %cst_39 : f32 to vector<16x128xf32>
    %181 = arith.minimumf %179, %180 : vector<16x128xf32>
    %c0_40 = arith.constant 0 : index
    %c0_41 = arith.constant 0 : index
    %182 = vector.load %arg4[%c0_40, %c0_41] : memref<16x128xf32, #tpu.memory_space<vmem>>, vector<16x128xf32>
    tpu.vector_store %arg4[%c0_40, %c0_41], %181 {strides = array<i32>} : memref<16x128xf32, #tpu.memory_space<vmem>>, vector<16x128xf32>,
    return
  }
  func.func @transform_0(%arg0: i32) -> i32 {
    %c0_i32 = arith.constant 0 : i32
    %c0_i32_0 = arith.constant 0 : i32
    return %c0_i32 : i32
  }
  func.func @transform_1(%arg0: i32) -> i32 {
    %c0_i32 = arith.constant 0 : i32
    %c0_i32_0 = arith.constant 0 : i32
    return %c0_i32 : i32
  }
  func.func @transform_2(%arg0: i32) -> (i32, i32) {
    %c0_i32 = arith.constant 0 : i32
    %c0_i32_0 = arith.constant 0 : i32
    return %arg0, %c0_i32 : i32, i32
  }
  func.func @transform_3(%arg0: i32) -> (i32, i32) {
    %c0_i32 = arith.constant 0 : i32
    %c0_i32_0 = arith.constant 0 : i32
    return %arg0, %c0_i32 : i32, i32
  }
}

</mosaic_0001>

<bundles_post_ra>
// kernel: pwl_tone_mapping.1
= control target key start
LH: loop header
LB: loop body
LE: loop exit
PB: predicated region body
PF: predicated region fallthrough
CT: control target
= control target key end

     0   :  { %8 = vsyncpa [#allocation3], 0  ;;  %s536_s0 = inlined_call_operand.vmem [shape: s32[30], index: 0, kind: input, shape index: {}]   ;;  %s537_s1 = inlined_call_operand.vmem [shape: f32[4], index: 1, kind: input, shape index: {}]   ;;  %s538_s2 = inlined_call_operand.vmem [shape: f32[16,128], index: 2, kind: input, shape index: {}]   ;;  %s539_s3 = inlined_call_operand.vmem [shape: f32[16,128], index: 3, kind: output, shape index: {}]  }
   0x1   :  { %s16_s14 = sshll.u32 %s536_s0, 4  ;;  %s17_s14 = int_to_ptr.vmem [resolvable:$true] %s16_s14 }
   0x2   :  { %9 = vsyncpa [#allocation5], 0  ;;  %s26_s17 = sshll.u32 %s537_s1, 4  ;;  %s303_s18 = scalar_lea.vmem %s17_s14, 16  ;;  %s27_s17 = int_to_ptr.vmem [resolvable:$true] %s26_s17 }
   0x3   :  { %p304_p0 = scmp.ne.s32.totalorder %s17_s14, %s303_s18  ;;  %p308_p1 = scmp.lt.s32.totalorder %s17_s14, %s17_s14 }
   0x4   :  { %p309_p2 = scmp.lt.s32.totalorder %s303_s18, %s303_s18 }
   0x6   :  { %p310_p3 = por %p309_p2, %p308_p1 }
   0x8   :  { %p311_p4 = pnand %p310_p3, %p304_p0 }
   0xa   :  { %314 = shalt.err (!%p311_p4)
}
   0xb   :  { %s331_s19 = smov [#allocation2]   ;;  %s315_s20 = scalar_lea.vmem %s27_s17, 16 }
   0xc   :  { %19 = dma.vmem_to_smem %s17_s14, 16, %s331_s19, [#allocation3]  }
   0xd   :  { %p316_p5 = scmp.ne.s32.totalorder %s27_s17, %s315_s20  ;;  %p320_p6 = scmp.lt.s32.totalorder %s27_s17, %s27_s17 }
   0xe   :  { %p321_p7 = scmp.lt.s32.totalorder %s315_s20, %s315_s20 }
  0x10   :  { %p322_p8 = por %p321_p7, %p320_p6 }
  0x12   :  { %p323_p9 = pnand %p322_p8, %p316_p5 }
  0x14   :  { %326 = shalt.err (!%p323_p9)
}
  0x15   :  { %s332_s0 = smov [#allocation4]  }
  0x16   :  { %29 = dma.vmem_to_smem %s27_s17, 16, %s332_s0, [#allocation5]  }
  0x17   :  { %327 = dma.done.wait [#allocation3], 16  }
  0x18   :  { %328 = vsyncadd [#allocation3], 4294967280 }
  0x19   :  { %329 = dma.done.wait [#allocation5], 16  }
  0x1a   :  { %330 = vsyncadd [#allocation5], 4294967280 }
  0x1b   :  { %38 = sfence }
  0x1c   :  { %v362_v0 = vld [vmem:[%s538_s2] sm:$0xff]  ;;  %v367_v1 = vld [vmem:[%s538_s2 + $0x8] sm:$0xff]  ;;  %s49_s24 = sld [smem:[#allocation2]]  ;;  %s269_s25 = sld [smem:[#allocation2 + $0x1]] }
  0x1d   :  { %v41_v2 = vmul.f32 30.0, %v362_v0  ;;  %v42_v3 = vmul.f32 30.0, %v367_v1  ;;  %s270_s26 = sld [smem:[#allocation2 + $0x2]]  ;;  %s371_s27 = sld [smem:[#allocation2 + $0x3]] }
  0x1e   :  { %s373_s28 = sld [smem:[#allocation2 + $0x4]]  ;;  %s375_s29 = sld [smem:[#allocation2 + $0x5]] }
  0x1f   :  { %v43_v4 = vfloor.f32 %v41_v2  ;;  %v44_v5 = vfloor.f32 %v42_v3  ;;  %s377_s2 = sld [smem:[#allocation2 + $0x6]]  ;;  %s383_s30 = sld [smem:[#allocation2 + $0x7]] }
  0x20   :  { %s388_s4 = sld [smem:[#allocation2 + $0x8]]  ;;  %s394_s5 = sld [smem:[#allocation2 + $0x9]] }
  0x21   :  { %v45_v6 = vmax.f32 %v43_v4, 0.0  ;;  %v46_v7 = vmax.f32 %v44_v5, 0.0  ;;  %s400_s6 = sld [smem:[#allocation2 + $0xa]]  ;;  %s404_s7 = sld [smem:[#allocation2 + $0xb]] }
  0x22   :  { %v50_v10 = vstv %s49_s24  ;;  %v54_v11 = vstv %s269_s25  ;;  %s410_s8 = sld [smem:[#allocation2 + $0xc]]  ;;  %s412_s9 = sld [smem:[#allocation2 + $0xd]] }
  0x23   :  { %v379_v8 = vmin.f32 %v45_v6, 29.0  ;;  %v381_v9 = vmin.f32 %v46_v7, 29.0  ;;  %v60_v12 = vstv %s270_s26  ;;  %v66_v13 = vstv %s371_s27  ;;  %s418_s10 = sld [smem:[#allocation2 + $0xe]]  ;;  %s424_s11 = sld [smem:[#allocation2 + $0xf]] }
  0x24   :  { %v72_v14 = vstv %s373_s28  ;;  %v78_v15 = vstv %s375_s29  ;;  %s430_s12 = sld [smem:[#allocation2 + $0x10]]  ;;  %s432_s13 = sld [smem:[#allocation2 + $0x11]] }
  0x25   :  { %vm51_vm0 = vcmp.ge.f32.partialorder %v379_v8, 1.0  ;;  %vm52_vm1 = vcmp.ge.f32.partialorder %v381_v9, 1.0  ;;  %vm57_vm2 = vcmp.ge.f32.partialorder %v379_v8, 2.0  ;;  %vm58_vm3 = vcmp.ge.f32.partialorder %v381_v9, 2.0  ;;  %s438_s14 = sld [smem:[#allocation2 + $0x12]]  ;;  %s444_s15 = sld [smem:[#allocation2 + $0x13]] }
  0x26   :  { %v55_v16 = vsel %vm51_vm0, %v54_v11, %v50_v10  ;;  %v56_v17 = vsel %vm52_vm1, %v54_v11, %v50_v10  ;;  %vm63_vm4 = vcmp.ge.f32.partialorder %v379_v8, 3.0  ;;  %vm64_vm5 = vcmp.ge.f32.partialorder %v381_v9, 3.0  ;;  %s450_s16 = sld [smem:[#allocation2 + $0x14]]  ;;  %s452_s17 = sld [smem:[#allocation2 + $0x15]] }
  0x27   :  { %v61_v18 = vsel %vm57_vm2, %v60_v12, %v55_v16  ;;  %v62_v19 = vsel %vm58_vm3, %v60_v12, %v56_v17  ;;  %vm69_vm6 = vcmp.ge.f32.partialorder %v379_v8, 4.0  ;;  %vm70_vm7 = vcmp.ge.f32.partialorder %v381_v9, 4.0  ;;  %s458_s18 = sld [smem:[#allocation2 + $0x16]]  ;;  %s464_s19 = sld [smem:[#allocation2 + $0x17]] }
  0x28   :  { %v67_v20 = vsel %vm63_vm4, %v66_v13, %v61_v18  ;;  %v68_v21 = vsel %vm64_vm5, %v66_v13, %v62_v19  ;;  %vm75_vm8 = vcmp.ge.f32.partialorder %v379_v8, 5.0  ;;  %vm76_vm9 = vcmp.ge.f32.partialorder %v381_v9, 5.0  ;;  %s470_s20 = sld [smem:[#allocation2 + $0x18]]  ;;  %s472_s0 = sld [smem:[#allocation2 + $0x19]] }
  0x29   :  { %v73_v22 = vsel %vm69_vm6, %v72_v14, %v67_v20  ;;  %v74_v23 = vsel %vm70_vm7, %v72_v14, %v68_v21  ;;  %vm81_vm10 = vcmp.ge.f32.partialorder %v379_v8, 6.0  ;;  %vm82_vm11 = vcmp.ge.f32.partialorder %v381_v9, 6.0  ;;  %s478_s1 = sld [smem:[#allocation2 + $0x1a]]  ;;  %s484_s21 = sld [smem:[#allocation2 + $0x1b]] }
  0x2a   :  { %v79_v24 = vsel %vm75_vm8, %v78_v15, %v73_v22  ;;  %v80_v25 = vsel %vm76_vm9, %v78_v15, %v74_v23  ;;  %v84_v26 = vstv %s377_s2  ;;  %vm87_vm12 = vcmp.ge.f32.partialorder %v379_v8, 7.0  ;;  %s490_s22 = sld [smem:[#allocation2 + $0x1c]]  ;;  %s492_s23 = sld [smem:[#allocation2 + $0x1d]] }
  0x2b   :  { %v85_v27 = vsel %vm81_vm10, %v84_v26, %v79_v24  ;;  %v86_v28 = vsel %vm82_vm11, %v84_v26, %v80_v25  ;;  %vm88_vm13 = vcmp.ge.f32.partialorder %v381_v9, 7.0  ;;  %v90_v29 = vstv %s383_s30  ;;  %s504_s24 = sld [smem:[#allocation4 + $0x2]]  ;;  %s506_s25 = sld [smem:[#allocation4]] }
  0x2c   :  { %v91_v30 = vsel %vm87_vm12, %v90_v29, %v85_v27  ;;  %v92_v31 = vsel %vm88_vm13, %v90_v29, %v86_v28  ;;  %vm93_vm14 = vcmp.ge.f32.partialorder %v379_v8, 8.0  ;;  %vm94_vm15 = vcmp.ge.f32.partialorder %v381_v9, 8.0  ;;  %s512_s26 = sld [smem:[#allocation4 + $0x3]]  ;;  %s514_s27 = sld [smem:[#allocation4 + $0x1]] }
  0x2d   :  { %v96_v32 = vstv %s388_s4  ;;  %vm99_vm0 = vcmp.ge.f32.partialorder %v379_v8, 9.0  ;;  %vm100_vm1 = vcmp.ge.f32.partialorder %v381_v9, 9.0  ;;  %v102_v33 = vstv %s394_s5 }
  0x2e   :  { %v97_v34 = vsel %vm93_vm14, %v96_v32, %v91_v30  ;;  %v98_v35 = vsel %vm94_vm15, %v96_v32, %v92_v31  ;;  %vm105_vm2 = vcmp.ge.f32.partialorder %v379_v8, 10.0  ;;  %vm106_vm3 = vcmp.ge.f32.partialorder %v381_v9, 10.0 }
  0x2f   :  { %v103_v36 = vsel %vm99_vm0, %v102_v33, %v97_v34  ;;  %v104_v37 = vsel %vm100_vm1, %v102_v33, %v98_v35  ;;  %v108_v38 = vstv %s400_s6  ;;  %vm111_vm4 = vcmp.ge.f32.partialorder %v379_v8, 11.0 }
  0x30   :  { %v109_v39 = vsel %vm105_vm2, %v108_v38, %v103_v36  ;;  %v110_v40 = vsel %vm106_vm3, %v108_v38, %v104_v37  ;;  %vm112_vm5 = vcmp.ge.f32.partialorder %v381_v9, 11.0  ;;  %v114_v41 = vstv %s404_s7 }
  0x31   :  { %v115_v42 = vsel %vm111_vm4, %v114_v41, %v109_v39  ;;  %v116_v43 = vsel %vm112_vm5, %v114_v41, %v110_v40  ;;  %vm117_vm6 = vcmp.ge.f32.partialorder %v379_v8, 12.0  ;;  %vm118_vm7 = vcmp.ge.f32.partialorder %v381_v9, 12.0 }
  0x32   :  { %v120_v44 = vstv %s410_s8  ;;  %vm123_vm8 = vcmp.ge.f32.partialorder %v379_v8, 13.0  ;;  %vm124_vm9 = vcmp.ge.f32.partialorder %v381_v9, 13.0  ;;  %v126_v45 = vstv %s412_s9 }
  0x33   :  { %v121_v46 = vsel %vm117_vm6, %v120_v44, %v115_v42  ;;  %v122_v47 = vsel %vm118_vm7, %v120_v44, %v116_v43  ;;  %vm129_vm10 = vcmp.ge.f32.partialorder %v379_v8, 14.0  ;;  %vm130_vm11 = vcmp.ge.f32.partialorder %v381_v9, 14.0 }
  0x34   :  { %v127_v48 = vsel %vm123_vm8, %v126_v45, %v121_v46  ;;  %v128_v49 = vsel %vm124_vm9, %v126_v45, %v122_v47  ;;  %v132_v50 = vstv %s418_s10  ;;  %vm135_vm12 = vcmp.ge.f32.partialorder %v379_v8, 15.0 }
  0x35   :  { %v133_v51 = vsel %vm129_vm10, %v132_v50, %v127_v48  ;;  %v134_v52 = vsel %vm130_vm11, %v132_v50, %v128_v49  ;;  %vm136_vm13 = vcmp.ge.f32.partialorder %v381_v9, 15.0  ;;  %v138_v53 = vstv %s424_s11 }
  0x36   :  { %v139_v54 = vsel %vm135_vm12, %v138_v53, %v133_v51  ;;  %v140_v55 = vsel %vm136_vm13, %v138_v53, %v134_v52  ;;  %vm141_vm14 = vcmp.ge.f32.partialorder %v379_v8, 16.0  ;;  %vm142_vm15 = vcmp.ge.f32.partialorder %v381_v9, 16.0 }
  0x37   :  { %v144_v56 = vstv %s430_s12  ;;  %vm147_vm0 = vcmp.ge.f32.partialorder %v379_v8, 17.0  ;;  %vm148_vm1 = vcmp.ge.f32.partialorder %v381_v9, 17.0  ;;  %v150_v57 = vstv %s432_s13 }
  0x38   :  { %v145_v58 = vsel %vm141_vm14, %v144_v56, %v139_v54  ;;  %v146_v59 = vsel %vm142_vm15, %v144_v56, %v140_v55  ;;  %vm153_vm2 = vcmp.ge.f32.partialorder %v379_v8, 18.0  ;;  %vm154_vm3 = vcmp.ge.f32.partialorder %v381_v9, 18.0 }
  0x39   :  { %v151_v60 = vsel %vm147_vm0, %v150_v57, %v145_v58  ;;  %v152_v61 = vsel %vm148_vm1, %v150_v57, %v146_v59  ;;  %v156_v62 = vstv %s438_s14  ;;  %vm159_vm4 = vcmp.ge.f32.partialorder %v379_v8, 19.0 }
  0x3a   :  { %v157_v63 = vsel %vm153_vm2, %v156_v62, %v151_v60  ;;  %v158_v2 = vsel %vm154_vm3, %v156_v62, %v152_v61  ;;  %vm160_vm5 = vcmp.ge.f32.partialorder %v381_v9, 19.0  ;;  %v162_v3 = vstv %s444_s15 }
  0x3b   :  { %v163_v4 = vsel %vm159_vm4, %v162_v3, %v157_v63  ;;  %v164_v5 = vsel %vm160_vm5, %v162_v3, %v158_v2  ;;  %vm165_vm6 = vcmp.ge.f32.partialorder %v379_v8, 20.0  ;;  %vm166_vm7 = vcmp.ge.f32.partialorder %v381_v9, 20.0 }
  0x3c   :  { %v168_v6 = vstv %s450_s16  ;;  %vm171_vm8 = vcmp.ge.f32.partialorder %v379_v8, 21.0  ;;  %vm172_vm9 = vcmp.ge.f32.partialorder %v381_v9, 21.0  ;;  %v174_v7 = vstv %s452_s17 }
  0x3d   :  { %v169_v10 = vsel %vm165_vm6, %v168_v6, %v163_v4  ;;  %v170_v11 = vsel %vm166_vm7, %v168_v6, %v164_v5  ;;  %vm177_vm10 = vcmp.ge.f32.partialorder %v379_v8, 22.0  ;;  %vm178_vm11 = vcmp.ge.f32.partialorder %v381_v9, 22.0 }
  0x3e   :  { %v175_v12 = vsel %vm171_vm8, %v174_v7, %v169_v10  ;;  %v176_v13 = vsel %vm172_vm9, %v174_v7, %v170_v11  ;;  %v180_v14 = vstv %s458_s18  ;;  %vm183_vm12 = vcmp.ge.f32.partialorder %v379_v8, 23.0 }
  0x3f   :  { %v181_v15 = vsel %vm177_vm10, %v180_v14, %v175_v12  ;;  %v182_v16 = vsel %vm178_vm11, %v180_v14, %v176_v13  ;;  %vm184_vm13 = vcmp.ge.f32.partialorder %v381_v9, 23.0  ;;  %v186_v17 = vstv %s464_s19 }
  0x40   :  { %v187_v18 = vsel %vm183_vm12, %v186_v17, %v181_v15  ;;  %v188_v19 = vsel %vm184_vm13, %v186_v17, %v182_v16  ;;  %vm189_vm14 = vcmp.ge.f32.partialorder %v379_v8, 24.0  ;;  %vm190_vm15 = vcmp.ge.f32.partialorder %v381_v9, 24.0 }
  0x41   :  { %v192_v20 = vstv %s470_s20  ;;  %vm195_vm0 = vcmp.ge.f32.partialorder %v379_v8, 25.0  ;;  %vm196_vm1 = vcmp.ge.f32.partialorder %v381_v9, 25.0  ;;  %v198_v21 = vstv %s472_s0 }
  0x42   :  { %v193_v22 = vsel %vm189_vm14, %v192_v20, %v187_v18  ;;  %v194_v23 = vsel %vm190_vm15, %v192_v20, %v188_v19  ;;  %vm201_vm2 = vcmp.ge.f32.partialorder %v379_v8, 26.0  ;;  %vm202_vm3 = vcmp.ge.f32.partialorder %v381_v9, 26.0 }
  0x43   :  { %v199_v24 = vsel %vm195_vm0, %v198_v21, %v193_v22  ;;  %v200_v25 = vsel %vm196_vm1, %v198_v21, %v194_v23  ;;  %v204_v26 = vstv %s478_s1  ;;  %vm207_vm4 = vcmp.ge.f32.partialorder %v379_v8, 27.0 }
  0x44   :  { %v205_v27 = vsel %vm201_vm2, %v204_v26, %v199_v24  ;;  %v206_v28 = vsel %vm202_vm3, %v204_v26, %v200_v25  ;;  %vm208_vm5 = vcmp.ge.f32.partialorder %v381_v9, 27.0  ;;  %v210_v29 = vstv %s484_s21 }
  0x45   :  { %v211_v30 = vsel %vm207_vm4, %v210_v29, %v205_v27  ;;  %v212_v31 = vsel %vm208_vm5, %v210_v29, %v206_v28  ;;  %vm213_vm6 = vcmp.ge.f32.partialorder %v379_v8, 28.0  ;;  %vm214_vm7 = vcmp.ge.f32.partialorder %v381_v9, 28.0 }
  0x46   :  { %v216_v32 = vstv %s490_s22  ;;  %vm219_vm8 = vcmp.ge.f32.partialorder %v379_v8, 29.0  ;;  %vm220_vm9 = vcmp.ge.f32.partialorder %v381_v9, 29.0  ;;  %v222_v33 = vstv %s492_s23 }
  0x47   :  { %v217_v34 = vsel %vm213_vm6, %v216_v32, %v211_v30  ;;  %v218_v35 = vsel %vm214_vm7, %v216_v32, %v212_v31  ;;  %v230_v42 = vstv %s504_s24  ;;  %v242_v43 = vstv %s506_s25 }
  0x48   :  { %v223_v36 = vsel %vm219_vm8, %v222_v33, %v217_v34  ;;  %v224_v37 = vsel %vm220_vm9, %v222_v33, %v218_v35  ;;  %v249_v44 = vmul.f32 0.033333335, %v379_v8  ;;  %v250_v45 = vmul.f32 0.033333335, %v381_v9 }
  0x49   :  { %v225_v38 = vshra.s32 %v223_v36, 16  ;;  %v226_v39 = vshra.s32 %v224_v37, 16  ;;  %v237_v40 = vand.u32 65535, %v223_v36  ;;  %v238_v41 = vand.u32 65535, %v224_v37 }
  0x4a   :  { %v234_v50 = vstv %s512_s26  ;;  %v246_v51 = vstv %s514_s27  ;;  %v251_v52 = vsub.f32 %v362_v0, %v249_v44  ;;  %v252_v53 = vsub.f32 %v367_v1, %v250_v45 }
  0x4b   :  { %v227_v46 = vcvt.s32.f32 %v225_v38  ;;  %v228_v47 = vcvt.s32.f32 %v226_v39  ;;  %v239_v48 = vcvt.s32.f32 %v237_v40  ;;  %v240_v49 = vcvt.s32.f32 %v238_v41 }
  0x4d   :  { %v231_v54 = vmul.f32 %v230_v42, %v227_v46  ;;  %v232_v55 = vmul.f32 %v230_v42, %v228_v47  ;;  %v243_v56 = vmul.f32 %v242_v43, %v239_v48  ;;  %v244_v57 = vmul.f32 %v242_v43, %v240_v49 }
  0x4f   :  { %v235_v58 = vadd.f32 %v234_v50, %v231_v54  ;;  %v236_v59 = vadd.f32 %v234_v50, %v232_v55  ;;  %v247_v60 = vadd.f32 %v246_v51, %v243_v56  ;;  %v248_v8 = vadd.f32 %v246_v51, %v244_v57 }
  0x51   :  { %v253_v61 = vmul.f32 %v251_v52, %v235_v58  ;;  %v254_v9 = vmul.f32 %v252_v53, %v236_v59 }
  0x53   :  { %v255_v62 = vadd.f32 %v253_v61, %v247_v60  ;;  %v256_v63 = vadd.f32 %v254_v9, %v248_v8 }
  0x55   :  { %v257_v2 = vmax.f32 %v255_v62, 0.0  ;;  %v258_v3 = vmax.f32 %v256_v63, 0.0 }
  0x57   :  { %v259_v4 = vmin.f32 %v257_v2, 1.0  ;;  %v260_v5 = vmin.f32 %v258_v3, 1.0 }
  0x59   :  { %261 = vst [vmem:[%s539_s3] sm:$0xff] %v259_v4  ;;  %262 = vst [vmem:[%s539_s3 + $0x8] sm:$0xff] %v260_v5 }
  0x5a   :  { %267 = vsyncpa [#allocation3], 1 }
  0x5b   :  { %268 = vsyncpa [#allocation5], 1 }

</bundles_post_ra>
